<compile_context>
chip_gen: v7x
topology: tpu7x:2x2x1
jax: 0.10.0
libtpu: 0.0.40
codegen_flags: <defaults>
</compile_context>

<pallas_src>
import functools

import jax
import jax.numpy as jnp
from jax.experimental import pallas as pl
from jax.experimental.pallas import tpu as pltpu


H1 = 128          # first hidden width (native, == LANES)
H2 = 64           # second hidden width (logical; padded to 128 lanes)
LANES = 128       # lane width of the packed weight / bias slabs


def _round_up(x, m):
    return ((x + m - 1) // m) * m


def dqn_kernel(x_ref, w_ref, b_ref, o_ref):
    # Packed bf16 weight slab layout (all 128 lanes wide, aligned slice starts):
    #   rows [0, 128)          : w2  (128 -> 64), cols 64:128 zero
    #   rows [128, 256)        : w3  (64 -> out), rows 64:128 and cols out:128 zero
    #   rows [256, 256 + din)  : w1  (din -> 128)
    out_dim = o_ref.shape[-1]
    w2 = w_ref[0:LANES, :]
    w3 = w_ref[LANES:2 * LANES, :]
    w1 = w_ref[2 * LANES:, :]

    # In-kernel bf16 cast of the f32 input block (no wrapper pre-op).
    x = x_ref[...].astype(jnp.bfloat16)                    # (TILE_B, din)

    # Layer 1: bf16 MXU matmul, f32 accumulate, f32 bias + ReLU.
    h1 = jnp.dot(x, w1, preferred_element_type=jnp.float32)
    h1 = jnp.maximum(h1 + b_ref[0:1, :], 0.0)

    # Layer 2 (padded cols 64:128 stay exactly zero: zero weights + zero bias).
    h2 = jnp.dot(h1.astype(jnp.bfloat16), w2, preferred_element_type=jnp.float32)
    h2 = jnp.maximum(h2 + b_ref[1:2, :], 0.0)

    # Layer 3: f32 accumulate + bias, then store only the real logits lanes.
    out = jnp.dot(h2.astype(jnp.bfloat16), w3, preferred_element_type=jnp.float32)
    o_ref[...] = (out + b_ref[2:3, :])[:, :out_dim]


def pack_params(params, input_dim, output_dim):
    """Pack (in,out)-layout weights/biases into one bf16 weight slab + one f32 bias slab."""
    assert H2 <= LANES, "hidden-2 width must fit in 128 lanes"
    assert output_dim <= LANES, "output head wider than 128 lanes is not supported"
    assert params["w1"].shape == (input_dim, H1) and H1 == LANES

    w2 = jnp.zeros((LANES, LANES), jnp.float32).at[:, :H2].set(params["w2"])
    w3 = jnp.zeros((LANES, LANES), jnp.float32).at[:H2, :output_dim].set(params["w3"])
    w1 = jnp.asarray(params["w1"], jnp.float32)            # (input_dim, 128), no row padding
    wbuf = jnp.concatenate([w2, w3, w1], axis=0).astype(jnp.bfloat16)

    bbuf = jnp.zeros((8, LANES), jnp.float32)
    bbuf = bbuf.at[0, :H1].set(params["b1"][0])
    bbuf = bbuf.at[1, :H2].set(params["b2"][0])
    bbuf = bbuf.at[2, :output_dim].set(params["b3"][0])
    return wbuf, bbuf


@functools.partial(jax.jit, static_argnames=("out_dim", "tile_b"))
def dqn_forward(x, wbuf, bbuf, out_dim, tile_b=512):
    """x: (B, input_dim) float32. wbuf/bbuf from pack_params. Returns (B, out_dim) f32."""
    B, din = x.shape
    if wbuf.shape[0] != din + 2 * LANES:
        raise ValueError("wbuf was packed for a different input_dim")

    # --- batch tiling -------------------------------------------------------
    tile_b = _round_up(max(int(tile_b), 16), 16)     # guard: multiple of 16
    if B <= 256:
        # Single-step latency path (tiny inference batches): size tile to B.
        tile = _round_up(B, 8)
    else:
        # Balanced, even number of steps so the "parallel" batch axis keeps
        # both v7x TensorCores busy; no-op on single-TC v5e/v6e.
        n_steps = max(2, pl.cdiv(B, tile_b))
        n_steps += n_steps % 2
        tile = _round_up(pl.cdiv(B, n_steps), 16)
    grid = (pl.cdiv(B, tile),)                       # ragged last block handled by Pallas

    out = pl.pallas_call(
        dqn_kernel,
        out_shape=jax.ShapeDtypeStruct((B, out_dim), jnp.float32),
        grid=grid,
        in_specs=[
            pl.BlockSpec((tile, din), lambda i: (i, 0)),      # batch-tiled x (native f32)
            pl.BlockSpec(wbuf.shape, lambda i: (0, 0)),       # VMEM-resident packed weights
            pl.BlockSpec(bbuf.shape, lambda i: (0, 0)),       # VMEM-resident packed biases
        ],
        out_specs=pl.BlockSpec((tile, out_dim), lambda i: (i, 0)),  # narrow (B, out_dim) output
        compiler_params=pltpu.CompilerParams(
            dimension_semantics=("parallel",),   # shard batch tiles across TCs (v7x)
            vmem_limit_bytes=32 << 20,           # covers v5e's lower scoped-VMEM default
        ),
    )(x, wbuf, bbuf)

    return out


def init_params(key, input_dim, output_dim):
    """Deterministic synthetic init (PyTorch-style uniform bounds), (in,out) layout."""
    def linear(key, fan_in, fan_out):
        kw, kb = jax.random.split(key)
        bound = 1.0 / jnp.sqrt(fan_in)
        w = jax.random.uniform(kw, (fan_in, fan_out), jnp.float32, -bound, bound)
        b = jax.random.uniform(kb, (1, fan_out), jnp.float32, -bound, bound)
        return w, b

    k1, k2, k3 = jax.random.split(key, 3)
    w1, b1 = linear(k1, input_dim, H1)
    w2, b2 = linear(k2, H1, H2)
    w3, b3 = linear(k3, H2, output_dim)
    return {"w1": w1, "b1": b1, "w2": w2, "b2": b2, "w3": w3, "b3": b3}


def dqn_reference(x, p):
    h1 = jnp.maximum(x @ p["w1"] + p["b1"], 0.0)
    h2 = jnp.maximum(h1 @ p["w2"] + p["b2"], 0.0)
    return h2 @ p["w3"] + p["b3"]


if __name__ == "__main__":
    key = jax.random.PRNGKey(0)
    k_params, k_x1, k_x2 = jax.random.split(key, 3)

    input_dim, output_dim = 16, 4       # snake state vector -> 4 actions
    params = init_params(k_params, input_dim, output_dim)
    wbuf, bbuf = pack_params(params, input_dim, output_dim)

    # Inference-style small batch (single-step latency path).
    x_small = jax.random.normal(k_x1, (8, input_dim), jnp.float32)
    out_small = jax.block_until_ready(dqn_forward(x_small, wbuf, bbuf, output_dim))
    ref_small = dqn_reference(x_small, params)
    assert out_small.shape == (8, output_dim)
    # bf16 MXU inputs with f32 accumulation: deliberate precision tradeoff vs f32 reference.
    assert jnp.allclose(out_small, ref_small, atol=5e-2, rtol=5e-2), "small-batch mismatch"

    # Replay-buffer-style batch: exercises the balanced multi-step (2-step) grid.
    x_big = jax.random.normal(k_x2, (384, input_dim), jnp.float32)
    out_big = jax.block_until_ready(dqn_forward(x_big, wbuf, bbuf, output_dim))
    ref_big = dqn_reference(x_big, params)
    assert out_big.shape == (384, output_dim)
    assert jnp.allclose(out_big, ref_big, atol=5e-2, rtol=5e-2), "big-batch mismatch"

    print("KERNEL_OK")
</pallas_src>

<mosaic_0001>
module attributes {stable_mosaic.version = 11 : i64} {
  func.func @dqn_kernel(%arg0: i32, %arg1: memref<8x16xf32, #tpu.memory_space<vmem>>, %arg2: memref<272x128xbf16, #tpu.memory_space<vmem>>, %arg3: memref<8x128xf32, #tpu.memory_space<vmem>>, %arg4: memref<8x4xf32, #tpu.memory_space<vmem>>) attributes {dimension_semantics = [#tpu.dimension_semantics<parallel>], iteration_bounds = array<i64: 1>, scalar_prefetch = 0 : i64, scratch_operands = 0 : i64, tpu.core_type = #tpu.core_type<tc>, window_params = [{transform_indices = @transform_0, window_bounds = array<i64: 8, 16>}, {pipeline_mode = #tpu.pipeline_mode<synchronous>, transform_indices = @transform_1, window_bounds = array<i64: 272, 128>}, {pipeline_mode = #tpu.pipeline_mode<synchronous>, transform_indices = @transform_2, window_bounds = array<i64: 8, 128>}, {transform_indices = @transform_3, window_bounds = array<i64: 8, 4>}]} {
    %c0 = arith.constant 0 : index
    %c0_0 = arith.constant 0 : index
    %0 = vector.load %arg2[%c0, %c0_0] : memref<272x128xbf16, #tpu.memory_space<vmem>>, vector<128x128xbf16>
    %c128 = arith.constant 128 : index
    %c0_1 = arith.constant 0 : index
    %1 = vector.load %arg2[%c128, %c0_1] : memref<272x128xbf16, #tpu.memory_space<vmem>>, vector<128x128xbf16>
    %c256 = arith.constant 256 : index
    %c0_2 = arith.constant 0 : index
    %2 = vector.load %arg2[%c256, %c0_2] : memref<272x128xbf16, #tpu.memory_space<vmem>>, vector<16x128xbf16>
    %c0_3 = arith.constant 0 : index
    %c0_4 = arith.constant 0 : index
    %3 = vector.load %arg1[%c0_3, %c0_4] : memref<8x16xf32, #tpu.memory_space<vmem>>, vector<8x16xf32>
    %4 = arith.truncf %3 : vector<8x16xf32> to vector<8x16xbf16>
    %cst = arith.constant dense<0.000000e+00> : vector<8x128xf32>
    %5 = tpu.matmul %4, %2, %cst {dimension_numbers = #tpu.dot_dimension_numbers<[1], [0], [0], [1], [0, 0, 1, 1], [], []>} : vector<8x16xbf16>, vector<16x128xbf16>, vector<8x128xf32> -> vector<8x128xf32>
    %c0_5 = arith.constant 0 : index
    %c0_6 = arith.constant 0 : index
    %6 = vector.load %arg3[%c0_5, %c0_6] : memref<8x128xf32, #tpu.memory_space<vmem>>, vector<1x128xf32>
    %7 = vector.broadcast %6 : vector<1x128xf32> to vector<8x128xf32>
    %8 = arith.addf %5, %7 : vector<8x128xf32>
    %cst_7 = arith.constant 0.000000e+00 : f32
    %9 = vector.broadcast %cst_7 : f32 to vector<8x128xf32>
    %10 = arith.maximumf %8, %9 : vector<8x128xf32>
    %11 = arith.truncf %10 : vector<8x128xf32> to vector<8x128xbf16>
    %cst_8 = arith.constant dense<0.000000e+00> : vector<8x128xf32>
    %12 = tpu.matmul %11, %0, %cst_8 {dimension_numbers = #tpu.dot_dimension_numbers<[1], [0], [0], [1], [0, 0, 1, 1], [], []>} : vector<8x128xbf16>, vector<128x128xbf16>, vector<8x128xf32> -> vector<8x128xf32>
    %c1 = arith.constant 1 : index
    %c0_9 = arith.constant 0 : index
    %13 = vector.load %arg3[%c1, %c0_9] : memref<8x128xf32, #tpu.memory_space<vmem>>, vector<1x128xf32>
    %14 = vector.broadcast %13 : vector<1x128xf32> to vector<8x128xf32>
    %15 = arith.addf %12, %14 : vector<8x128xf32>
    %cst_10 = arith.constant 0.000000e+00 : f32
    %16 = vector.broadcast %cst_10 : f32 to vector<8x128xf32>
    %17 = arith.maximumf %15, %16 : vector<8x128xf32>
    %18 = arith.truncf %17 : vector<8x128xf32> to vector<8x128xbf16>
    %cst_11 = arith.constant dense<0.000000e+00> : vector<8x128xf32>
    %19 = tpu.matmul %18, %1, %cst_11 {dimension_numbers = #tpu.dot_dimension_numbers<[1], [0], [0], [1], [0, 0, 1, 1], [], []>} : vector<8x128xbf16>, vector<128x128xbf16>, vector<8x128xf32> -> vector<8x128xf32>
    %c2 = arith.constant 2 : index
    %c0_12 = arith.constant 0 : index
    %20 = vector.load %arg3[%c2, %c0_12] : memref<8x128xf32, #tpu.memory_space<vmem>>, vector<1x128xf32>
    %21 = vector.broadcast %20 : vector<1x128xf32> to vector<8x128xf32>
    %22 = arith.addf %19, %21 : vector<8x128xf32>
    %23 = vector.extract_strided_slice %22 {offsets = [0, 0], sizes = [8, 4], strides = [1, 1]} : vector<8x128xf32> to vector<8x4xf32>
    %c0_13 = arith.constant 0 : index
    %c0_14 = arith.constant 0 : index
    %24 = vector.load %arg4[%c0_13, %c0_14] : memref<8x4xf32, #tpu.memory_space<vmem>>, vector<8x4xf32>
    tpu.vector_store %arg4[%c0_13, %c0_14], %23 {strides = array<i32>} : memref<8x4xf32, #tpu.memory_space<vmem>>, vector<8x4xf32>,
    return
  }
  func.func @transform_0(%arg0: i32) -> (i32, i32) {
    %c0_i32 = arith.constant 0 : i32
    %c0_i32_0 = arith.constant 0 : i32
    return %arg0, %c0_i32 : i32, i32
  }
  func.func @transform_1(%arg0: i32) -> (i32, i32) {
    %c0_i32 = arith.constant 0 : i32
    %c0_i32_0 = arith.constant 0 : i32
    %c0_i32_1 = arith.constant 0 : i32
    return %c0_i32, %c0_i32_0 : i32, i32
  }
  func.func @transform_2(%arg0: i32) -> (i32, i32) {
    %c0_i32 = arith.constant 0 : i32
    %c0_i32_0 = arith.constant 0 : i32
    %c0_i32_1 = arith.constant 0 : i32
    return %c0_i32, %c0_i32_0 : i32, i32
  }
  func.func @transform_3(%arg0: i32) -> (i32, i32) {
    %c0_i32 = arith.constant 0 : i32
    %c0_i32_0 = arith.constant 0 : i32
    return %arg0, %c0_i32 : i32, i32
  }
}

</mosaic_0001>

<bundles_post_ra>
// kernel: dqn_forward.1
= control target key start
LH: loop header
LB: loop body
LE: loop exit
PB: predicated region body
PF: predicated region fallthrough
CT: control target
= control target key end

     0   :  { %8 = vsyncpa [#allocation3], 0  ;;  %s608_s0 = inlined_call_operand.hbm [shape: f32[8,16], index: 0, kind: input, shape index: {}]   ;;  %s609_s1 = inlined_call_operand.hbm [shape: bf16[272,128], index: 1, kind: input, shape index: {}]   ;;  %s610_s2 = inlined_call_operand.hbm [shape: f32[8,128], index: 2, kind: input, shape index: {}]   ;;  %s611_s3 = inlined_call_operand.vmem [shape: f32[8,4], index: 3, kind: output, shape index: {}]  }
   0x1   :  { %9 = vsyncpa [#allocation5], 0  ;;  %s522_s12 = smov [#allocation4]   ;;  %s452_s16 = scalar_lea.hbm %s609_s1, 2176 }
   0x2   :  { %s25_s13 = sshll.u32 %s522_s12, 4  ;;  %p453_p0 = scmp.ne.s32.totalorder %s609_s1, %s452_s16  ;;  %s26_s13 = int_to_ptr.vmem [resolvable:$true] %s25_s13 }
   0x3   :  { %p456_p1 = scmp.lt.u32.totalorder %s452_s16, %s609_s1 }
   0x5   :  { %p458_p2 = pnand %p456_p1, %p453_p0 }
   0x7   :  { %461 = shalt.err (!%p458_p2)
}
   0x8   :  { %s462_s21 = scalar_lea.vmem %s26_s13, 2176  ;;  %p467_p4 = scmp.lt.s32.totalorder %s26_s13, %s26_s13 }
   0x9   :  { %p463_p3 = scmp.ne.s32.totalorder %s26_s13, %s462_s21  ;;  %p468_p5 = scmp.lt.s32.totalorder %s462_s21, %s462_s21 }
   0xb   :  { %p469_p6 = por %p468_p5, %p467_p4 }
   0xd   :  { %p470_p7 = pnand %p469_p6, %p463_p3 }
   0xf   :  { %473 = shalt.err (!%p470_p7)
}
  0x10   :  { %s523_s22 = smov 64   ;;  %s524_s23 = smov 4  }
  0x11   :  { %31 = dma.hbm_to_vmem [thread:$0]  %s609_s1, 2176, %s26_s13, [#allocation5], %s523_s22, %s523_s22, %s524_s23  }
  0x12   :  { %s525_s26 = smov [#allocation2]   ;;  %s526_s28 = smov [#allocation6]  }
  0x13   :  { %s16_s27 = sshll.u32 %s525_s26, 4  ;;  %s38_s29 = sshll.u32 %s526_s28, 4  ;;  %s17_s27 = int_to_ptr.vmem [resolvable:$true] %s16_s27  ;;  %s39_s29 = int_to_ptr.vmem [resolvable:$true] %s38_s29 }
  0x14   :  { %s474_s5 = scalar_lea.hbm %s608_s0, 128 }
  0x15   :  { %p475_p8 = scmp.ne.s32.totalorder %s608_s0, %s474_s5  ;;  %p478_p9 = scmp.lt.u32.totalorder %s474_s5, %s608_s0 }
  0x17   :  { %p480_p10 = pnand %p478_p9, %p475_p8 }
  0x19   :  { %483 = shalt.err (!%p480_p10)
}
  0x1a   :  { %s484_s1 = scalar_lea.vmem %s17_s27, 128  ;;  %p489_p12 = scmp.lt.s32.totalorder %s17_s27, %s17_s27 }
  0x1b   :  { %p485_p11 = scmp.ne.s32.totalorder %s17_s27, %s484_s1  ;;  %p490_p13 = scmp.lt.s32.totalorder %s484_s1, %s484_s1 }
  0x1d   :  { %p491_p0 = por %p490_p13, %p489_p12 }
  0x1f   :  { %p492_p1 = pnand %p491_p0, %p485_p11 }
  0x21   :  { %495 = shalt.err (!%p492_p1)
}
  0x22   :  { %19 = dma.hbm_to_vmem [thread:$0]  %s608_s0, 128, %s17_s27, [#allocation3]  }
  0x23   :  { %s496_s14 = scalar_lea.hbm %s610_s2, 128 }
  0x24   :  { %p497_p2 = scmp.ne.s32.totalorder %s610_s2, %s496_s14  ;;  %p500_p3 = scmp.lt.u32.totalorder %s496_s14, %s610_s2 }
  0x26   :  { %p502_p4 = pnand %p500_p3, %p497_p2 }
  0x28   :  { %505 = shalt.err (!%p502_p4)
}
  0x29   :  { %s506_s19 = scalar_lea.vmem %s39_s29, 128  ;;  %p511_p6 = scmp.lt.s32.totalorder %s39_s29, %s39_s29 }
  0x2a   :  { %p507_p5 = scmp.ne.s32.totalorder %s39_s29, %s506_s19  ;;  %p512_p7 = scmp.lt.s32.totalorder %s506_s19, %s506_s19 }
  0x2c   :  { %p513_p8 = por %p512_p7, %p511_p6 }
  0x2e   :  { %p514_p9 = pnand %p513_p8, %p507_p5 }
  0x30   :  { %517 = shalt.err (!%p514_p9)
}
  0x31   :  { %41 = dma.hbm_to_vmem [thread:$0]  %s610_s2, 128, %s39_s29, [#allocation5]  }
  0x32   :  { %518 = dma.done.wait [#allocation3], 128  }
  0x33   :  { %519 = vsyncadd [#allocation3], 4294967168 }
  0x34   :  { %520 = dma.done.wait [#allocation5], 2304  }
  0x35   :  { %521 = vsyncadd [#allocation5], 4294964992  ;;  %v527_v0 = vmov 0.0   ;;  %vm528_vm0 = vmmov 0   ;;  %v435_v1 = vld [vmem:[#allocation4 + $0x80] sm:$0xff]   ;;  %v86_v2 = vld [vmem:[#allocation2] sm:$0xff] }
  0x36   :  { %382 = vmatprep.subr.bf16.mxu0 %v527_v0  ;;  %384 = vmatprep.mubr.msk.bf16.mxu0 %vm528_vm0, %v527_v0  ;;  %v87_v3 = vpack.c.bf16 %v86_v2, %v86_v2  ;;  %vm99_vm1 = vcmask 130048   ;;  %v436_v4 = vld [vmem:[#allocation4] sm:$0xff]   ;;  %v437_v5 = vld [vmem:[#allocation4 + $0x8] sm:$0xff]   ;;  %v438_v6 = vld [vmem:[#allocation4 + $0x10] sm:$0xff]   ;;  %vm333_vm2 = vcmask 31744  }
  0x37   :  { %388 = vmatprep.subr.bf16.mxu1 %v527_v0  ;;  %404 = vmatprep.mubr.msk.bf16.mxu1 %vm528_vm0, %v527_v0  ;;  %v439_v7 = vld [vmem:[#allocation4 + $0x18] sm:$0xff]   ;;  %v440_v8 = vld [vmem:[#allocation4 + $0x20] sm:$0xff]   ;;  %v441_v9 = vld [vmem:[#allocation4 + $0x28] sm:$0xff]  }
  0x38   :  { %383 = vmatpush3.bf16.msra.mxu0 %v435_v1  ;;  %389 = vmatpush3.bf16.msra.mxu1 %v436_v4  ;;  %v442_v10 = vld [vmem:[#allocation4 + $0x30] sm:$0xff]   ;;  %v443_v11 = vld [vmem:[#allocation4 + $0x38] sm:$0xff]   ;;  %v444_v12 = vld [vmem:[#allocation4 + $0x40] sm:$0xff]  }
  0x39   :  { %408 = vmatprep.subr.bf16.mxu0 %v527_v0  ;;  %390 = vmatprep.subr.bf16.mxu1 %v527_v0  ;;  %v445_v13 = vld [vmem:[#allocation4 + $0x48] sm:$0xff]   ;;  %v446_v14 = vld [vmem:[#allocation4 + $0x50] sm:$0xff]   ;;  %v447_v15 = vld [vmem:[#allocation4 + $0x58] sm:$0xff]  }
  0x3a   :  { %v448_v16 = vld [vmem:[#allocation4 + $0x60] sm:$0xff]   ;;  %v449_v17 = vld [vmem:[#allocation4 + $0x68] sm:$0xff]   ;;  %v450_v26 = vld [vmem:[#allocation4 + $0x70] sm:$0xff]  }
  0x3b   :  { %385 = vmatmul.mubr.msk.bf16.vlgmr.msra.gmra.mrb[0].mxu0 %vm99_vm1, %v87_v3  ;;  %v341_v18 = vld [vmem:[#allocation6] ss:$0 sm:$0xff]  ;;  %v451_v27 = vld [vmem:[#allocation4 + $0x78] sm:$0xff]   ;;  %v344_v28 = vld [vmem:[#allocation6 + $0x1] ss:$0 sm:$0xff] }
  0x3c   :  { %424 = vmatprep.mubr.msk.bf16.mxu0 %vm528_vm0, %v527_v0  ;;  %391 = vmatpush3.bf16.msra.mxu1 %v437_v5  ;;  %v353_v36 = vld [vmem:[#allocation6 + $0x2] ss:$0 sm:$0xff] }
  0x3d   :  { %392 = vmatprep.subr.bf16.mxu1 %v527_v0  ;;  %409 = vmatpush3.bf16.msra.mxu0 %v444_v12 }
  0x3e   :  { %410 = vmatprep.subr.bf16.mxu0 %v527_v0 }
  0x40   :  { %393 = vmatpush3.bf16.msra.mxu1 %v438_v6 }
  0x41   :  { %394 = vmatprep.subr.bf16.mxu1 %v527_v0  ;;  %411 = vmatpush3.bf16.msra.mxu0 %v445_v13 }
  0x42   :  { %412 = vmatprep.subr.bf16.mxu0 %v527_v0 }
  0x44   :  { %395 = vmatpush3.bf16.msra.mxu1 %v439_v7 }
  0x45   :  { %396 = vmatprep.subr.bf16.mxu1 %v527_v0  ;;  %413 = vmatpush3.bf16.msra.mxu0 %v446_v14 }
  0x46   :  { %414 = vmatprep.subr.bf16.mxu0 %v527_v0 }
  0x48   :  { %397 = vmatpush3.bf16.msra.mxu1 %v440_v8 }
  0x49   :  { %398 = vmatprep.subr.bf16.mxu1 %v527_v0  ;;  %415 = vmatpush3.bf16.msra.mxu0 %v447_v15 }
  0x4a   :  { %416 = vmatprep.subr.bf16.mxu0 %v527_v0 }
  0x4c   :  { %399 = vmatpush3.bf16.msra.mxu1 %v441_v9 }
  0x4d   :  { %400 = vmatprep.subr.bf16.mxu1 %v527_v0  ;;  %417 = vmatpush3.bf16.msra.mxu0 %v448_v16 }
  0x4e   :  { %418 = vmatprep.subr.bf16.mxu0 %v527_v0 }
  0x50   :  { %401 = vmatpush3.bf16.msra.mxu1 %v442_v10 }
  0x51   :  { %402 = vmatprep.subr.bf16.mxu1 %v527_v0  ;;  %419 = vmatpush3.bf16.msra.mxu0 %v449_v17 }
  0x52   :  { %420 = vmatprep.subr.bf16.mxu0 %v527_v0 }
  0x54   :  { %403 = vmatpush3.bf16.msra.mxu1 %v443_v11 }
  0x55   :  { %421 = vmatpush3.bf16.msra.mxu0 %v450_v26 }
  0x56   :  { %422 = vmatprep.subr.bf16.mxu0 %v527_v0 }
  0x59   :  { %423 = vmatpush3.bf16.msra.mxu0 %v451_v27 }
 0x10e   :  { %v137_v19 = vpop.f32.mrb[0].mxu0 }
 0x10f   :  { %v138_v20 = vadd.f32 %v341_v18, %v137_v19  ;;  %v386_v21 = vpop.f32.mrb[1].mxu0 }
 0x110   :  { %v140_v22 = vpop.f32.mrb[2].mxu0 }
 0x111   :  { %v143_v23 = vmax.f32 %v138_v20, 0.0  ;;  %v387_v24 = vpop.f32.mrb[3].mxu0 }
 0x113   :  { %v144_v25 = vpack.c.bf16 %v143_v23, %v143_v23 }
 0x115   :  { %405 = vmatmul.mubr.bf16.vlgmr.msra.gmra.mrb[0].mxu1 %v144_v25 }
 0x1e8   :  { %v232_v29 = vpop.f32.mrb[0].mxu1 }
 0x1e9   :  { %v233_v30 = vadd.f32 %v344_v28, %v232_v29  ;;  %v406_v31 = vpop.f32.mrb[1].mxu1 }
 0x1ea   :  { %v235_v32 = vpop.f32.mrb[2].mxu1 }
 0x1eb   :  { %v238_v33 = vmax.f32 %v233_v30, 0.0  ;;  %v407_v34 = vpop.f32.mrb[3].mxu1 }
 0x1ed   :  { %v239_v35 = vpack.c.bf16 %v238_v33, %v238_v33 }
 0x1ef   :  { %425 = vmatmul.mubr.bf16.vlgmr.msra.gmra.mrb[4].mxu0 %v239_v35 }
 0x2c2   :  { %v327_v37 = vpop.f32.mrb[4].mxu0 }
 0x2c3   :  { %v328_v38 = vadd.f32 %v353_v36, %v327_v37  ;;  %v426_v39 = vpop.f32.mrb[5].mxu0 }
 0x2c4   :  { %v330_v40 = vpop.f32.mrb[6].mxu0 }
 0x2c5   :  { %334 = vst.msk [vmem:[%s611_s3] sm:$0xff] %vm333_vm2, %v328_v38  ;;  %v427_v41 = vpop.f32.mrb[7].mxu0 }
 0x2c6   :  { %339 = vsyncpa [#allocation3], 1 }
 0x2c7   :  { %340 = vsyncpa [#allocation5], 1 }

</bundles_post_ra>
